<compile_context>
chip_gen: v6e
topology: v6e:2x2x1
jax: 0.10.0
libtpu: 0.0.40
codegen_flags: <defaults>
</compile_context>

<pallas_src>
import math

import jax
import jax.numpy as jnp
from jax.experimental import pallas as pl
from jax.experimental.pallas import tpu as pltpu


# ----------------------------- kernel -----------------------------------------


def _actnorm_affine_kernel(x_ref, mu_ref, ls_ref, z_ref):
    """z = x * exp(log_sigma) + mu on one (tm, W) row block.

    mu_ref / ls_ref are resident (1, W) float32 tiles; x/z stay in caller dtype.
    """
    scale = jnp.exp(ls_ref[...])                       # (1, W) f32, EUP, hidden under DMA
    xf = x_ref[...].astype(jnp.float32)                # in-register upcast (v5e-safe)
    z_ref[...] = (xf * scale + mu_ref[...]).astype(z_ref.dtype)


# ----------------------------- wrapper -----------------------------------------


def _pick_row_tile(rows, width, itemsize, max_rows, byte_budget):
    """Largest row tile (multiple of 8) fitting the per-block byte budget."""
    if rows <= 8:
        return rows                                    # single full-array block
    tm = byte_budget // (width * itemsize)
    tm = int(max(8, min(max_rows, tm)))
    tm = (tm // 8) * 8
    if rows <= tm:
        return rows                                    # single full-array block
    return tm


def actnorm_forward(x, mu, log_sigma, *, max_block_rows=8192,
                    block_byte_budget=4 << 20):
    """ActNorm forward: returns (z, log_diag, log_det) like the PyTorch module."""
    N, dim = x.shape
    out_dtype = x.dtype

    # log_det: dim-element parameter-only reduction -> plain JAX (fused for free).
    log_det = jnp.sum(log_sigma.astype(jnp.float32))
    log_diag = log_sigma                               # untouched parameter

    # --- layout selection -------------------------------------------------------
    # Lane-dense slab of width W = lcm(dim, 128) whenever the reshape is a free
    # (contiguous) view, i.e. N is a multiple of reps = W // dim.
    W = math.lcm(dim, 128)
    reps = W // dim
    lane_dense = (N % reps == 0)

    mu_f = mu.astype(jnp.float32)
    ls_f = log_sigma.astype(jnp.float32)

    if lane_dense:
        Wk = W
        rows = N // reps
        xk = x.reshape(rows, Wk) if reps > 1 else x
        mu_k = (jnp.tile(mu_f, reps) if reps > 1 else mu_f).reshape(1, Wk)
        ls_k = (jnp.tile(ls_f, reps) if reps > 1 else ls_f).reshape(1, Wk)
    else:
        # Direct (N, dim) layout: correct everywhere; stores are masked when
        # dim is not a multiple of 128, but there is no extra pad/copy pass.
        Wk = dim
        rows = N
        xk = x
        mu_k = mu_f.reshape(1, Wk)
        ls_k = ls_f.reshape(1, Wk)

    tm = _pick_row_tile(rows, Wk, jnp.dtype(out_dtype).itemsize,
                        max_block_rows, block_byte_budget)

    zk = pl.pallas_call(
        _actnorm_affine_kernel,
        out_shape=jax.ShapeDtypeStruct((rows, Wk), out_dtype),
        grid=(pl.cdiv(rows, tm),),                     # ragged tail handled by Pallas
        in_specs=[
            pl.BlockSpec((tm, Wk), lambda i: (i, 0)),  # x row block (streamed)
            pl.BlockSpec((1, Wk), lambda i: (0, 0)),   # mu (resident)
            pl.BlockSpec((1, Wk), lambda i: (0, 0)),   # log_sigma (resident)
        ],
        out_specs=pl.BlockSpec((tm, Wk), lambda i: (i, 0)),
        compiler_params=pltpu.CompilerParams(
            dimension_semantics=("parallel",),
            vmem_limit_bytes=48 << 20),
    )(xk, mu_k, ls_k)

    z = zk.reshape(N, dim) if (lane_dense and reps > 1) else zk
    return z, log_diag, log_det


# ----------------------------- demo / self-test --------------------------------


if __name__ == "__main__":
    key = jax.random.PRNGKey(0)
    kx, km, ks, kx2, km2, ks2, kx3, kx4 = jax.random.split(key, 8)

    # 1) Lane-dense path (dim divides 128, N multiple of reps).
    N, dim = 64, 8
    x = jax.random.normal(kx, (N, dim), jnp.float32)
    mu = 0.5 * jax.random.normal(km, (dim,), jnp.float32)
    log_sigma = 0.1 * jax.random.normal(ks, (dim,), jnp.float32)

    z, log_diag, log_det = actnorm_forward(x, mu, log_sigma)
    z = jax.block_until_ready(z)
    log_det = jax.block_until_ready(log_det)

    z_ref = x * jnp.exp(log_sigma)[None, :] + mu[None, :]
    assert z.shape == (N, dim) and z.dtype == x.dtype
    assert bool(jnp.allclose(z, z_ref, rtol=1e-6, atol=1e-6))
    assert bool(jnp.allclose(log_det, jnp.sum(log_sigma), rtol=1e-6, atol=1e-6))
    assert bool(jnp.allclose(log_diag, log_sigma)) and log_diag.dtype == log_sigma.dtype

    # 2) Fallback path (N not a multiple of reps -> direct (N, dim) layout).
    N2, dim2 = 24, 12
    x2 = jax.random.normal(kx2, (N2, dim2), jnp.float32)
    mu2 = 0.5 * jax.random.normal(km2, (dim2,), jnp.float32)
    ls2 = 0.1 * jax.random.normal(ks2, (dim2,), jnp.float32)
    z2, ld2, det2 = actnorm_forward(x2, mu2, ls2)
    z2 = jax.block_until_ready(z2)
    z2_ref = x2 * jnp.exp(ls2)[None, :] + mu2[None, :]
    assert bool(jnp.allclose(z2, z2_ref, rtol=1e-6, atol=1e-6))
    assert bool(jnp.allclose(det2, jnp.sum(ls2), rtol=1e-6, atol=1e-6))

    # 3) Ragged multi-block grid (forced small tile) — exercises cdiv tail masking.
    N3, dim3 = 40, 128
    x3 = jax.random.normal(kx3, (N3, dim3), jnp.float32)
    mu3 = jnp.linspace(-1.0, 1.0, dim3, dtype=jnp.float32)
    ls3 = jnp.linspace(-0.2, 0.2, dim3, dtype=jnp.float32)
    z3, _, det3 = actnorm_forward(x3, mu3, ls3, max_block_rows=16)
    z3 = jax.block_until_ready(z3)
    z3_ref = x3 * jnp.exp(ls3)[None, :] + mu3[None, :]
    assert bool(jnp.allclose(z3, z3_ref, rtol=1e-6, atol=1e-6))

    # 4) bf16 I/O (dtype preserved end-to-end).
    x4 = jax.random.normal(kx4, (N, dim), jnp.float32).astype(jnp.bfloat16)
    z4, _, _ = actnorm_forward(x4, mu, log_sigma)
    z4 = jax.block_until_ready(z4)
    z4_ref = (x4.astype(jnp.float32) * jnp.exp(log_sigma)[None, :] + mu[None, :])
    assert z4.dtype == jnp.bfloat16
    assert bool(jnp.allclose(z4.astype(jnp.float32), z4_ref, rtol=2e-2, atol=2e-2))

    print("KERNEL_OK")
</pallas_src>

<mosaic_0001>
module attributes {stable_mosaic.version = 11 : i64} {
  func.func @_actnorm_affine_kernel(%arg0: i32, %arg1: memref<4x128xf32, #tpu.memory_space<vmem>>, %arg2: memref<1x128xf32, #tpu.memory_space<vmem>>, %arg3: memref<1x128xf32, #tpu.memory_space<vmem>>, %arg4: memref<4x128xf32, #tpu.memory_space<vmem>>) attributes {dimension_semantics = [#tpu.dimension_semantics<parallel>], iteration_bounds = array<i64: 1>, scalar_prefetch = 0 : i64, scratch_operands = 0 : i64, tpu.core_type = #tpu.core_type<tc>, window_params = [{transform_indices = @transform_0, window_bounds = array<i64: 4, 128>}, {pipeline_mode = #tpu.pipeline_mode<synchronous>, transform_indices = @transform_1, window_bounds = array<i64: 1, 128>}, {pipeline_mode = #tpu.pipeline_mode<synchronous>, transform_indices = @transform_2, window_bounds = array<i64: 1, 128>}, {transform_indices = @transform_3, window_bounds = array<i64: 4, 128>}]} {
    %c0 = arith.constant 0 : index
    %c0_0 = arith.constant 0 : index
    %0 = vector.load %arg3[%c0, %c0_0] : memref<1x128xf32, #tpu.memory_space<vmem>>, vector<1x128xf32>
    %1 = math.exp %0 : vector<1x128xf32>
    %c0_1 = arith.constant 0 : index
    %c0_2 = arith.constant 0 : index
    %2 = vector.load %arg1[%c0_1, %c0_2] : memref<4x128xf32, #tpu.memory_space<vmem>>, vector<4x128xf32>
    %3 = vector.broadcast %1 : vector<1x128xf32> to vector<4x128xf32>
    %4 = arith.mulf %2, %3 : vector<4x128xf32>
    %c0_3 = arith.constant 0 : index
    %c0_4 = arith.constant 0 : index
    %5 = vector.load %arg2[%c0_3, %c0_4] : memref<1x128xf32, #tpu.memory_space<vmem>>, vector<1x128xf32>
    %6 = vector.broadcast %5 : vector<1x128xf32> to vector<4x128xf32>
    %7 = arith.addf %4, %6 : vector<4x128xf32>
    %c0_5 = arith.constant 0 : index
    %c0_6 = arith.constant 0 : index
    %8 = vector.load %arg4[%c0_5, %c0_6] : memref<4x128xf32, #tpu.memory_space<vmem>>, vector<4x128xf32>
    tpu.vector_store %arg4[%c0_5, %c0_6], %7 {strides = array<i32>} : memref<4x128xf32, #tpu.memory_space<vmem>>, vector<4x128xf32>,
    return
  }
  func.func @transform_0(%arg0: i32) -> (i32, i32) {
    %c0_i32 = arith.constant 0 : i32
    %c0_i32_0 = arith.constant 0 : i32
    return %arg0, %c0_i32 : i32, i32
  }
  func.func @transform_1(%arg0: i32) -> (i32, i32) {
    %c0_i32 = arith.constant 0 : i32
    %c0_i32_0 = arith.constant 0 : i32
    %c0_i32_1 = arith.constant 0 : i32
    return %c0_i32, %c0_i32_0 : i32, i32
  }
  func.func @transform_2(%arg0: i32) -> (i32, i32) {
    %c0_i32 = arith.constant 0 : i32
    %c0_i32_0 = arith.constant 0 : i32
    %c0_i32_1 = arith.constant 0 : i32
    return %c0_i32, %c0_i32_0 : i32, i32
  }
  func.func @transform_3(%arg0: i32) -> (i32, i32) {
    %c0_i32 = arith.constant 0 : i32
    %c0_i32_0 = arith.constant 0 : i32
    return %arg0, %c0_i32 : i32, i32
  }
}

</mosaic_0001>

<bundles_post_ra>
// kernel: tpu_custom_call.1
= control target key start
LH: loop header
LB: loop body
LE: loop exit
PB: predicated region body
PF: predicated region fallthrough
CT: control target
= control target key end

     0   :  { %8 = vsyncpa [#allocation3], 0  ;;  %s145_s0 = inlined_call_operand.hbm [shape: f32[4,128], index: 0, kind: input, shape index: {}]   ;;  %s146_s1 = inlined_call_operand.vmem [shape: f32[1,128], index: 1, kind: input, shape index: {}]   ;;  %s147_s2 = inlined_call_operand.vmem [shape: f32[1,128], index: 2, kind: input, shape index: {}]   ;;  %s148_s3 = inlined_call_operand.hbm [shape: f32[4,128], index: 3, kind: output, shape index: {}]  }
   0x1   :  { %9 = vsyncpa [#allocation4], 0  ;;  %s111_s12 = smov [#allocation2]  }
   0x2   :  { %s16_s13 = sshll.u32 %s111_s12, 4  ;;  %s17_s13 = int_to_ptr.vmem [resolvable:$true] %s16_s13 }
   0x3   :  { %s75_s14 = scalar_lea.vmem %s17_s13, 64  ;;  %p80_p1 = scmp.lt.s32.totalorder %s17_s13, %s17_s13 }
   0x4   :  { %p76_p0 = scmp.ne.s32.totalorder %s17_s13, %s75_s14  ;;  %p81_p2 = scmp.lt.s32.totalorder %s75_s14, %s75_s14 }
   0x6   :  { %p82_p3 = por %p81_p2, %p80_p1 }
   0x8   :  { %p83_p4 = pnand %p82_p3, %p76_p0 }
   0xa   :  { %86 = shalt.err (!%p83_p4)
}
   0xb   :  { %19 = dma.hbm_to_vmem [thread:$0]  %s145_s0, 64, %s17_s13, [#allocation3]  }
   0xc   :  { %107 = dma.done.wait [#allocation3], 64  }
   0xd   :  { %108 = vsyncadd [#allocation3], 4294967232  ;;  %v27_v0 = vld [vmem:[%s147_s2] sm:$0x1]  ;;  %v32_v2 = vlaneseq  ;;  %s112_s21 = smov [#allocation5]  }
   0xe   :  { %v28_v1 = vmul.f32 1.442695, %v27_v0  ;;  %v30_v6 = vld [vmem:[#allocation2] sm:$0xf]  ;;  %s53_s0 = sshll.u32 %s112_s21, 4  ;;  %s54_s0 = int_to_ptr.vmem [resolvable:$true] %s53_s0 }
   0xf   :  { %v33_v3 = vshrl.u32 %v32_v2, 7  ;;  %v62_v8 = vld [vmem:[%s146_s1] ss:$0 sm:$0xff]  ;;  %s87_s22 = scalar_lea.vmem %s54_s0, 64  ;;  %p92_p6 = scmp.lt.s32.totalorder %s54_s0, %s54_s0 }
  0x10   :  { %65 = vpow2.f32 %v28_v1  ;;  %p88_p5 = scmp.ne.s32.totalorder %s54_s0, %s87_s22  ;;  %p93_p7 = scmp.lt.s32.totalorder %s87_s22, %s87_s22 }
  0x11   :  { %v34_v4 = vsub.s32 0, %v33_v3 }
  0x12   :  { %p94_p8 = por %p93_p7, %p92_p6 }
  0x14   :  { %p95_p9 = pnand %p94_p8, %p88_p5 }
  0x1d   :  { %v66_v5 = vpop.eup %65 }
  0x1e   :  { %v35_v7 = vrot.slane %v66_v5, %v34_v4 }
  0x20   :  { %v37_v9 = vmul.f32 %v35_v7, %v30_v6 }
  0x22   :  { %v45_v10 = vadd.f32 %v62_v8, %v37_v9 }
  0x24   :  { %46 = vst [vmem:[#allocation5] sm:$0xf] %v45_v10 }
  0x25   :  { %98 = shalt.err (!%p95_p9)
}
  0x26   :  { %56 = dma.vmem_to_hbm [thread:$0]  %s54_s0, 64, %s148_s3, [#allocation4]  }
  0x27   :  { %109 = dma.done.wait [#allocation4], 64  }
  0x28   :  { %110 = vsyncadd [#allocation4], 4294967232 }
  0x29   :  { %60 = vsyncpa [#allocation3], 1 }
  0x2a   :  { %61 = vsyncpa [#allocation4], 1 }

</bundles_post_ra>
